<compile_context>
chip_gen: v5e
topology: v5e:2x2
jax: 0.10.0
libtpu: 0.0.40
codegen_flags: <defaults>
</compile_context>

<pallas_src>
import functools

import numpy as np
import jax
import jax.numpy as jnp
from jax import lax
from jax.experimental import pallas as pl
from jax.experimental.pallas import tpu as pltpu


_SQRT_HALF = np.float32(1.0 / np.sqrt(2.0))


def _round_up(n, m):
    return ((n + m - 1) // m) * m


def _gelu(x, approximate=False):
    if approximate:
        # tanh-approx GELU (EUP slot) -- opt-in only: deviates slightly from
        # PyTorch's default exact erf GELU.
        c = np.float32(np.sqrt(2.0 / np.pi))
        return 0.5 * x * (1.0 + jnp.tanh(c * (x + np.float32(0.044715) * (x * x * x))))
    # PyTorch nn.GELU() default: exact erf-based GELU.
    return 0.5 * x * (1.0 + lax.erf(x * _SQRT_HALF))


def _layernorm_1pass(x, gamma, beta, n_true, eps=1e-5):
    # One data pass: sum and sum-of-squares back-to-back (XLU slot),
    # var = E[x^2] - mu^2, divided by the TRUE feature count so zero-padded
    # lanes (gamma = beta = 0 there) do not perturb the statistics.
    inv_n = np.float32(1.0 / n_true)
    s1 = jnp.sum(x, axis=-1, keepdims=True)
    s2 = jnp.sum(x * x, axis=-1, keepdims=True)
    mu = s1 * inv_n
    var = jnp.maximum(s2 * inv_n - mu * mu, 0.0)
    return (x - mu) * lax.rsqrt(var + np.float32(eps)) * gamma + beta


# ---------------------------------------------------------------------------
# Kernel: fc1 -> LN -> GELU -> (conv-as-matmul -> LN -> GELU -> +res) -> fc2
# on a [tb, H_pad] tile resident in VMEM.  MXU operands in w1_ref.dtype
# (bf16 by default); accumulation and all elementwise math in f32.
# ---------------------------------------------------------------------------
def eig_head_kernel(x_ref, w1_ref, mconv_ref, w2_ref, vecs_ref, b2_ref, o_ref,
                    *, h_true, approximate_gelu):
    vecs = vecs_ref[...]                        # [8, H_pad] packed f32 vectors
    b1, g1, be1 = vecs[0:1, :], vecs[1:2, :], vecs[2:3, :]
    bconv, gc, bc = vecs[3:4, :], vecs[4:5, :], vecs[5:6, :]

    cdt = w1_ref.dtype                           # MXU operand dtype (bf16/f32)
    x = x_ref[...].astype(cdt)

    # --- fc1 (K = true in_features; no K padding needed for the MXU) ---
    h = jnp.dot(x, w1_ref[...], preferred_element_type=jnp.float32) + b1

    # --- layer_norm1 + GELU (f32) ---
    h = _layernorm_1pass(h, g1, be1, h_true)
    h = _gelu(h, approximate_gelu)
    residual = h

    # --- Conv1d (k=3, pad=1) as one dense matmul on the flat [tb, H] layout ---
    c = jnp.dot(h.astype(cdt), mconv_ref[...],
                preferred_element_type=jnp.float32) + bconv

    # --- layer_norm_conv (normalizes jointly over all [reshape_dim, seq]) ---
    c = _layernorm_1pass(c, gc, bc, h_true)
    c = _gelu(c, approximate_gelu)

    # --- residual add ---
    h2 = c + residual

    # --- fc2 (lane-dense padded output) ---
    out = jnp.dot(h2.astype(cdt), w2_ref[...],
                  preferred_element_type=jnp.float32) + b2_ref[...]
    o_ref[...] = out.astype(o_ref.dtype)


# ---------------------------------------------------------------------------
# Wrapper: balanced batch tiling, resident single-buffered weights,
# generation-aware VMEM limit.
# ---------------------------------------------------------------------------
def eigenvalue_spectrum_head(x, kernel_params, *, tile_b=256, approximate_gelu=False):
    """x: [B, in_features] (f32 or bf16). Returns f32 [B, output_dim]."""
    w1, mconv, w2, vecs, b2, dims = kernel_params
    in_true, h_true, out_true = dims
    B = x.shape[0]
    INP, HP = w1.shape                 # INP == true in_features (unpadded K)
    OUTP = w2.shape[1]
    assert x.shape[1] == in_true == INP, "x feature dim mismatch"

    # --- batch tiling: balanced tiles, minimal padding, >=2 steps when big ---
    nt = pl.cdiv(B, max(8, tile_b))
    if B >= 64:
        nt = max(nt, 2)                # let both v7x TensorCores get work
    if nt == 1:
        tb, Bp = B, B                  # single full-array tile: no pad needed
    else:
        tb = _round_up(pl.cdiv(B, nt), 8)
        Bp = nt * tb
    if Bp != B:
        x = jnp.pad(x, ((0, Bp - B), (0, 0)))   # rows only; features untouched
    grid = (nt,)

    # --- cost estimate ---
    xbytes = x.dtype.itemsize
    wbytes = w1.dtype.itemsize
    flops = 2 * Bp * (INP * HP + HP * HP + HP * OUTP)
    bytes_accessed = (xbytes * Bp * INP + 4 * Bp * OUTP
                      + wbytes * (INP * HP + HP * HP + HP * OUTP)
                      + 4 * (8 * HP + OUTP))
    cost = pl.CostEstimate(flops=int(flops), transcendentals=int(2 * Bp * HP),
                           bytes_accessed=int(bytes_accessed))

    # --- generation-aware VMEM budget (no hard 64 MiB clamp on 128 MiB chips) ---
    try:
        vmem_cap = int(pltpu.get_tpu_info().vmem_capacity_bytes)
    except Exception:
        vmem_cap = 64 * 1024 * 1024          # v7x-safe fallback
    weight_res = wbytes * (INP * HP + HP * HP + HP * OUTP) + 4 * (8 * HP + OUTP)
    stream_res = 2 * tb * (xbytes * INP + 4 * OUTP)   # double-buffered x / out tiles
    work_res = 6 * tb * HP * 4                        # live f32 intermediates
    vmem_limit = int(min(int(0.9 * vmem_cap),
                         max(32 * 1024 * 1024,
                             int(1.5 * (weight_res + stream_res + work_res)))))

    def _build(single_buffer_weights):
        res_kw = {"pipeline_mode": pl.Buffered(1)} if single_buffer_weights else {}

        def resident(shape):
            return pl.BlockSpec(shape, lambda i: (0, 0), **res_kw)

        in_specs = [
            pl.BlockSpec((tb, INP), lambda i: (i, 0)),   # x tile (pipelined)
            resident((INP, HP)),                          # w1
            resident((HP, HP)),                           # conv-as-matmul matrix
            resident((HP, OUTP)),                         # w2
            resident((8, HP)),                            # packed bias/LN vectors
            resident((1, OUTP)),                          # b2
        ]
        out_specs = pl.BlockSpec((tb, OUTP), lambda i: (i, 0))
        return pl.pallas_call(
            functools.partial(eig_head_kernel, h_true=h_true,
                              approximate_gelu=approximate_gelu),
            out_shape=jax.ShapeDtypeStruct((Bp, OUTP), jnp.float32),
            grid=grid,
            in_specs=in_specs,
            out_specs=out_specs,
            compiler_params=pltpu.CompilerParams(
                dimension_semantics=("parallel",),
                vmem_limit_bytes=vmem_limit),
            cost_estimate=cost,
        )

    try:
        out_padded = _build(True)(x, w1, mconv, w2, vecs, b2)
    except Exception:
        # Fallback for JAX builds that reject single-buffer pipeline_mode.
        out_padded = _build(False)(x, w1, mconv, w2, vecs, b2)

    return out_padded[:B, :out_true]


# ---------------------------------------------------------------------------
# Parameter construction (deterministic) + conv-as-matmul matrix.
# ---------------------------------------------------------------------------
def build_conv_matrix(w_conv, C, S):
    """M[ci*S + s, co*S + t] = sum_k w_conv[co, ci, k] * [s == t + k - 1]."""
    H = C * S
    M = np.zeros((H, H), dtype=np.float32)
    w = np.asarray(w_conv)
    for co in range(C):
        for ci in range(C):
            for k in range(3):
                for t in range(S):
                    s = t + k - 1
                    if 0 <= s < S:
                        M[ci * S + s, co * S + t] += w[co, ci, k]
    return jnp.asarray(M)


def make_params(key, in_features, hidden_dim, output_dim, reshape_dim=16,
                compute_dtype=jnp.bfloat16):
    seq_len = hidden_dim // reshape_dim
    ks = jax.random.split(key, 6)
    w1 = jax.random.normal(ks[0], (in_features, hidden_dim), jnp.float32) * 0.05
    b1 = jax.random.normal(ks[1], (hidden_dim,), jnp.float32) * 0.05
    g1 = jnp.ones((hidden_dim,), jnp.float32)       # LayerNorm init: weight=1
    be1 = jnp.zeros((hidden_dim,), jnp.float32)     # LayerNorm init: bias=0
    w_conv = jax.random.normal(ks[2], (reshape_dim, reshape_dim, 3), jnp.float32) * 0.1
    b_conv = jax.random.normal(ks[3], (reshape_dim,), jnp.float32) * 0.05
    gc = jnp.ones((reshape_dim, seq_len), jnp.float32)
    bc = jnp.zeros((reshape_dim, seq_len), jnp.float32)
    w2 = jax.random.normal(ks[4], (hidden_dim, output_dim), jnp.float32) * 0.05
    b2 = jax.random.normal(ks[5], (output_dim,), jnp.float32) * 0.05

    mconv = build_conv_matrix(w_conv, reshape_dim, seq_len)
    bconv_flat = jnp.repeat(b_conv, seq_len)        # [H], c*S + t order
    gc_flat = gc.reshape(-1)
    bc_flat = bc.reshape(-1)

    # Hidden / output dims padded to multiples of 128 (lane-dense); padded
    # columns/rows are zero so the forward math is unchanged and the padded
    # output lanes are sliced off outside.  The input-feature (K) dim is NOT
    # padded: the MXU does not need it and it would force an extra HBM pass
    # over the activations in the wrapper.
    HP = _round_up(hidden_dim, 128)
    OUTP = _round_up(output_dim, 128)

    w1p = jnp.pad(w1, ((0, 0), (0, HP - hidden_dim))).astype(compute_dtype)
    mconvp = jnp.pad(mconv, ((0, HP - hidden_dim), (0, HP - hidden_dim))).astype(compute_dtype)
    w2p = jnp.pad(w2, ((0, HP - hidden_dim), (0, OUTP - output_dim))).astype(compute_dtype)

    # Pack the six per-feature vectors into one [8, HP] array (single DMA);
    # kept f32 so the LN / bias / elementwise path stays f32 on all chips.
    vecs = jnp.zeros((8, HP), jnp.float32)
    vecs = vecs.at[0, :hidden_dim].set(b1)
    vecs = vecs.at[1, :hidden_dim].set(g1)
    vecs = vecs.at[2, :hidden_dim].set(be1)
    vecs = vecs.at[3, :hidden_dim].set(bconv_flat)
    vecs = vecs.at[4, :hidden_dim].set(gc_flat)
    vecs = vecs.at[5, :hidden_dim].set(bc_flat)

    b2p = jnp.zeros((1, OUTP), jnp.float32).at[0, :output_dim].set(b2)

    kernel_params = (w1p, mconvp, w2p, vecs, b2p,
                     (in_features, hidden_dim, output_dim))
    ref_params = (w1, b1, g1, be1, w_conv, b_conv, gc, bc, w2, b2)
    return kernel_params, ref_params


def reference_forward(x, ref_params, reshape_dim=16):
    """Pure-JAX reproduction of the PyTorch module's forward (validation)."""
    (w1, b1, g1, be1, w_conv, b_conv, gc, bc, w2, b2) = ref_params
    B = x.shape[0]
    H = w1.shape[1]
    S = H // reshape_dim
    eps = 1e-5

    h = x @ w1 + b1
    mu = h.mean(-1, keepdims=True)
    var = ((h - mu) ** 2).mean(-1, keepdims=True)
    h = (h - mu) / jnp.sqrt(var + eps) * g1 + be1
    h = jax.nn.gelu(h, approximate=False)

    hr = h.reshape(B, reshape_dim, S)
    residual = hr
    conv = lax.conv_general_dilated(hr, w_conv, window_strides=(1,),
                                    padding=[(1, 1)],
                                    dimension_numbers=("NCH", "OIH", "NCH"))
    conv = conv + b_conv[None, :, None]
    flat = conv.reshape(B, -1)
    mu2 = flat.mean(-1, keepdims=True)
    var2 = ((flat - mu2) ** 2).mean(-1, keepdims=True)
    normed = ((flat - mu2) / jnp.sqrt(var2 + eps)).reshape(B, reshape_dim, S)
    normed = normed * gc[None] + bc[None]
    c = jax.nn.gelu(normed, approximate=False) + residual
    return c.reshape(B, -1) @ w2 + b2


if __name__ == "__main__":
    # Small shapes consistent with the module (hidden_dim divisible by 16).
    B, IN, HID, OUT = 8, 64, 64, 48
    key = jax.random.PRNGKey(0)
    kx, kp = jax.random.split(key)
    x = jax.random.normal(kx, (B, IN), jnp.float32)

    ref = None

    # 1) f32 MXU path: tight check of the exact forward-pass semantics.
    params_f32, ref_params = make_params(kp, IN, HID, OUT,
                                         compute_dtype=jnp.float32)
    out_f32 = jax.block_until_ready(eigenvalue_spectrum_head(x, params_f32))
    ref = reference_forward(x, ref_params)
    np.testing.assert_allclose(np.asarray(out_f32), np.asarray(ref),
                               rtol=2e-4, atol=2e-4)

    # 2) bf16 MXU path (production default): loose tolerance for bf16 rounding.
    params_bf16, _ = make_params(kp, IN, HID, OUT)   # compute_dtype=bf16 default
    out_bf16 = jax.block_until_ready(eigenvalue_spectrum_head(x, params_bf16))
    np.testing.assert_allclose(np.asarray(out_bf16), np.asarray(ref),
                               rtol=5e-2, atol=5e-2)

    print("KERNEL_OK")
</pallas_src>

<mosaic_0001>
module attributes {stable_mosaic.version = 11 : i64} {
  func.func @eig_head_kernel(%arg0: i32, %arg1: memref<8x64xf32, #tpu.memory_space<vmem>>, %arg2: memref<64x128xf32, #tpu.memory_space<vmem>>, %arg3: memref<128x128xf32, #tpu.memory_space<vmem>>, %arg4: memref<128x128xf32, #tpu.memory_space<vmem>>, %arg5: memref<8x128xf32, #tpu.memory_space<vmem>>, %arg6: memref<1x128xf32, #tpu.memory_space<vmem>>, %arg7: memref<8x128xf32, #tpu.memory_space<vmem>>) attributes {dimension_semantics = [#tpu.dimension_semantics<parallel>], iteration_bounds = array<i64: 1>, scalar_prefetch = 0 : i64, scratch_operands = 0 : i64, tpu.core_type = #tpu.core_type<tc>, window_params = [{transform_indices = @transform_0, window_bounds = array<i64: 8, 64>}, {pipeline_mode = #tpu.pipeline_mode<synchronous>, transform_indices = @transform_1, window_bounds = array<i64: 64, 128>}, {pipeline_mode = #tpu.pipeline_mode<synchronous>, transform_indices = @transform_2, window_bounds = array<i64: 128, 128>}, {pipeline_mode = #tpu.pipeline_mode<synchronous>, transform_indices = @transform_3, window_bounds = array<i64: 128, 128>}, {pipeline_mode = #tpu.pipeline_mode<synchronous>, transform_indices = @transform_4, window_bounds = array<i64: 8, 128>}, {pipeline_mode = #tpu.pipeline_mode<synchronous>, transform_indices = @transform_5, window_bounds = array<i64: 1, 128>}, {transform_indices = @transform_6, window_bounds = array<i64: 8, 128>}]} {
    %c0 = arith.constant 0 : index
    %c0_0 = arith.constant 0 : index
    %0 = vector.load %arg5[%c0, %c0_0] : memref<8x128xf32, #tpu.memory_space<vmem>>, vector<8x128xf32>
    %1 = vector.extract_strided_slice %0 {offsets = [0, 0], sizes = [1, 128], strides = [1, 1]} : vector<8x128xf32> to vector<1x128xf32>
    %2 = vector.extract_strided_slice %0 {offsets = [1, 0], sizes = [1, 128], strides = [1, 1]} : vector<8x128xf32> to vector<1x128xf32>
    %3 = vector.extract_strided_slice %0 {offsets = [2, 0], sizes = [1, 128], strides = [1, 1]} : vector<8x128xf32> to vector<1x128xf32>
    %4 = vector.extract_strided_slice %0 {offsets = [3, 0], sizes = [1, 128], strides = [1, 1]} : vector<8x128xf32> to vector<1x128xf32>
    %5 = vector.extract_strided_slice %0 {offsets = [4, 0], sizes = [1, 128], strides = [1, 1]} : vector<8x128xf32> to vector<1x128xf32>
    %6 = vector.extract_strided_slice %0 {offsets = [5, 0], sizes = [1, 128], strides = [1, 1]} : vector<8x128xf32> to vector<1x128xf32>
    %c0_1 = arith.constant 0 : index
    %c0_2 = arith.constant 0 : index
    %7 = vector.load %arg1[%c0_1, %c0_2] : memref<8x64xf32, #tpu.memory_space<vmem>>, vector<8x64xf32>
    %c0_3 = arith.constant 0 : index
    %c0_4 = arith.constant 0 : index
    %8 = vector.load %arg2[%c0_3, %c0_4] : memref<64x128xf32, #tpu.memory_space<vmem>>, vector<64x128xf32>
    %cst = arith.constant dense<0.000000e+00> : vector<8x128xf32>
    %9 = tpu.matmul %7, %8, %cst {dimension_numbers = #tpu.dot_dimension_numbers<[1], [0], [0], [1], [0, 0, 1, 1], [], []>} : vector<8x64xf32>, vector<64x128xf32>, vector<8x128xf32> -> vector<8x128xf32>
    %10 = vector.broadcast %1 : vector<1x128xf32> to vector<8x128xf32>
    %11 = arith.addf %9, %10 : vector<8x128xf32>
    %cst_5 = arith.constant dense<0.000000e+00> : vector<8xf32>
    %12 = vector.multi_reduction <add>, %11, %cst_5 [1] : vector<8x128xf32> to vector<8xf32>
    %13 = vector.shape_cast %12 : vector<8xf32> to vector<8x1xf32>
    %14 = arith.mulf %11, %11 : vector<8x128xf32>
    %cst_6 = arith.constant dense<0.000000e+00> : vector<8xf32>
    %15 = vector.multi_reduction <add>, %14, %cst_6 [1] : vector<8x128xf32> to vector<8xf32>
    %16 = vector.shape_cast %15 : vector<8xf32> to vector<8x1xf32>
    %cst_7 = arith.constant 1.562500e-02 : f32
    %17 = vector.broadcast %cst_7 : f32 to vector<8x1xf32>
    %18 = arith.mulf %13, %17 : vector<8x1xf32>
    %cst_8 = arith.constant 1.562500e-02 : f32
    %19 = vector.broadcast %cst_8 : f32 to vector<8x1xf32>
    %20 = arith.mulf %16, %19 : vector<8x1xf32>
    %21 = arith.mulf %18, %18 : vector<8x1xf32>
    %22 = arith.subf %20, %21 : vector<8x1xf32>
    %cst_9 = arith.constant 0.000000e+00 : f32
    %23 = vector.broadcast %cst_9 : f32 to vector<8x1xf32>
    %24 = arith.maximumf %22, %23 : vector<8x1xf32>
    %25 = vector.broadcast %18 : vector<8x1xf32> to vector<8x128xf32>
    %26 = arith.subf %11, %25 : vector<8x128xf32>
    %cst_10 = arith.constant 9.99999974E-6 : f32
    %27 = vector.broadcast %cst_10 : f32 to vector<8x1xf32>
    %28 = arith.addf %24, %27 : vector<8x1xf32>
    %29 = math.rsqrt %28 : vector<8x1xf32>
    %30 = vector.broadcast %29 : vector<8x1xf32> to vector<8x128xf32>
    %31 = arith.mulf %26, %30 : vector<8x128xf32>
    %32 = vector.broadcast %2 : vector<1x128xf32> to vector<8x128xf32>
    %33 = arith.mulf %31, %32 : vector<8x128xf32>
    %34 = vector.broadcast %3 : vector<1x128xf32> to vector<8x128xf32>
    %35 = arith.addf %33, %34 : vector<8x128xf32>
    %cst_11 = arith.constant 5.000000e-01 : f32
    %36 = vector.broadcast %cst_11 : f32 to vector<8x128xf32>
    %37 = arith.mulf %36, %35 : vector<8x128xf32>
    %cst_12 = arith.constant 0.707106769 : f32
    %38 = vector.broadcast %cst_12 : f32 to vector<8x128xf32>
    %39 = arith.mulf %35, %38 : vector<8x128xf32>
    %40 = math.erf %39 : vector<8x128xf32>
    %cst_13 = arith.constant 1.000000e+00 : f32
    %41 = vector.broadcast %cst_13 : f32 to vector<8x128xf32>
    %42 = arith.addf %41, %40 : vector<8x128xf32>
    %43 = arith.mulf %37, %42 : vector<8x128xf32>
    %c0_14 = arith.constant 0 : index
    %c0_15 = arith.constant 0 : index
    %44 = vector.load %arg3[%c0_14, %c0_15] : memref<128x128xf32, #tpu.memory_space<vmem>>, vector<128x128xf32>
    %cst_16 = arith.constant dense<0.000000e+00> : vector<8x128xf32>
    %45 = tpu.matmul %43, %44, %cst_16 {dimension_numbers = #tpu.dot_dimension_numbers<[1], [0], [0], [1], [0, 0, 1, 1], [], []>} : vector<8x128xf32>, vector<128x128xf32>, vector<8x128xf32> -> vector<8x128xf32>
    %46 = vector.broadcast %4 : vector<1x128xf32> to vector<8x128xf32>
    %47 = arith.addf %45, %46 : vector<8x128xf32>
    %cst_17 = arith.constant dense<0.000000e+00> : vector<8xf32>
    %48 = vector.multi_reduction <add>, %47, %cst_17 [1] : vector<8x128xf32> to vector<8xf32>
    %49 = vector.shape_cast %48 : vector<8xf32> to vector<8x1xf32>
    %50 = arith.mulf %47, %47 : vector<8x128xf32>
    %cst_18 = arith.constant dense<0.000000e+00> : vector<8xf32>
    %51 = vector.multi_reduction <add>, %50, %cst_18 [1] : vector<8x128xf32> to vector<8xf32>
    %52 = vector.shape_cast %51 : vector<8xf32> to vector<8x1xf32>
    %cst_19 = arith.constant 1.562500e-02 : f32
    %53 = vector.broadcast %cst_19 : f32 to vector<8x1xf32>
    %54 = arith.mulf %49, %53 : vector<8x1xf32>
    %cst_20 = arith.constant 1.562500e-02 : f32
    %55 = vector.broadcast %cst_20 : f32 to vector<8x1xf32>
    %56 = arith.mulf %52, %55 : vector<8x1xf32>
    %57 = arith.mulf %54, %54 : vector<8x1xf32>
    %58 = arith.subf %56, %57 : vector<8x1xf32>
    %cst_21 = arith.constant 0.000000e+00 : f32
    %59 = vector.broadcast %cst_21 : f32 to vector<8x1xf32>
    %60 = arith.maximumf %58, %59 : vector<8x1xf32>
    %61 = vector.broadcast %54 : vector<8x1xf32> to vector<8x128xf32>
    %62 = arith.subf %47, %61 : vector<8x128xf32>
    %cst_22 = arith.constant 9.99999974E-6 : f32
    %63 = vector.broadcast %cst_22 : f32 to vector<8x1xf32>
    %64 = arith.addf %60, %63 : vector<8x1xf32>
    %65 = math.rsqrt %64 : vector<8x1xf32>
    %66 = vector.broadcast %65 : vector<8x1xf32> to vector<8x128xf32>
    %67 = arith.mulf %62, %66 : vector<8x128xf32>
    %68 = vector.broadcast %5 : vector<1x128xf32> to vector<8x128xf32>
    %69 = arith.mulf %67, %68 : vector<8x128xf32>
    %70 = vector.broadcast %6 : vector<1x128xf32> to vector<8x128xf32>
    %71 = arith.addf %69, %70 : vector<8x128xf32>
    %cst_23 = arith.constant 5.000000e-01 : f32
    %72 = vector.broadcast %cst_23 : f32 to vector<8x128xf32>
    %73 = arith.mulf %72, %71 : vector<8x128xf32>
    %cst_24 = arith.constant 0.707106769 : f32
    %74 = vector.broadcast %cst_24 : f32 to vector<8x128xf32>
    %75 = arith.mulf %71, %74 : vector<8x128xf32>
    %76 = math.erf %75 : vector<8x128xf32>
    %cst_25 = arith.constant 1.000000e+00 : f32
    %77 = vector.broadcast %cst_25 : f32 to vector<8x128xf32>
    %78 = arith.addf %77, %76 : vector<8x128xf32>
    %79 = arith.mulf %73, %78 : vector<8x128xf32>
    %80 = arith.addf %79, %43 : vector<8x128xf32>
    %c0_26 = arith.constant 0 : index
    %c0_27 = arith.constant 0 : index
    %81 = vector.load %arg4[%c0_26, %c0_27] : memref<128x128xf32, #tpu.memory_space<vmem>>, vector<128x128xf32>
    %cst_28 = arith.constant dense<0.000000e+00> : vector<8x128xf32>
    %82 = tpu.matmul %80, %81, %cst_28 {dimension_numbers = #tpu.dot_dimension_numbers<[1], [0], [0], [1], [0, 0, 1, 1], [], []>} : vector<8x128xf32>, vector<128x128xf32>, vector<8x128xf32> -> vector<8x128xf32>
    %c0_29 = arith.constant 0 : index
    %c0_30 = arith.constant 0 : index
    %83 = vector.load %arg6[%c0_29, %c0_30] : memref<1x128xf32, #tpu.memory_space<vmem>>, vector<1x128xf32>
    %84 = vector.broadcast %83 : vector<1x128xf32> to vector<8x128xf32>
    %85 = arith.addf %82, %84 : vector<8x128xf32>
    %c0_31 = arith.constant 0 : index
    %c0_32 = arith.constant 0 : index
    %86 = vector.load %arg7[%c0_31, %c0_32] : memref<8x128xf32, #tpu.memory_space<vmem>>, vector<8x128xf32>
    tpu.vector_store %arg7[%c0_31, %c0_32], %85 {strides = array<i32>} : memref<8x128xf32, #tpu.memory_space<vmem>>, vector<8x128xf32>,
    return
  }
  func.func @transform_0(%arg0: i32) -> (i32, i32) {
    %c0_i32 = arith.constant 0 : i32
    %c0_i32_0 = arith.constant 0 : i32
    return %arg0, %c0_i32 : i32, i32
  }
  func.func @transform_1(%arg0: i32) -> (i32, i32) {
    %c0_i32 = arith.constant 0 : i32
    %c0_i32_0 = arith.constant 0 : i32
    %c0_i32_1 = arith.constant 0 : i32
    return %c0_i32, %c0_i32_0 : i32, i32
  }
  func.func @transform_2(%arg0: i32) -> (i32, i32) {
    %c0_i32 = arith.constant 0 : i32
    %c0_i32_0 = arith.constant 0 : i32
    %c0_i32_1 = arith.constant 0 : i32
    return %c0_i32, %c0_i32_0 : i32, i32
  }
  func.func @transform_3(%arg0: i32) -> (i32, i32) {
    %c0_i32 = arith.constant 0 : i32
    %c0_i32_0 = arith.constant 0 : i32
    %c0_i32_1 = arith.constant 0 : i32
    return %c0_i32, %c0_i32_0 : i32, i32
  }
  func.func @transform_4(%arg0: i32) -> (i32, i32) {
    %c0_i32 = arith.constant 0 : i32
    %c0_i32_0 = arith.constant 0 : i32
    %c0_i32_1 = arith.constant 0 : i32
    return %c0_i32, %c0_i32_0 : i32, i32
  }
  func.func @transform_5(%arg0: i32) -> (i32, i32) {
    %c0_i32 = arith.constant 0 : i32
    %c0_i32_0 = arith.constant 0 : i32
    %c0_i32_1 = arith.constant 0 : i32
    return %c0_i32, %c0_i32_0 : i32, i32
  }
  func.func @transform_6(%arg0: i32) -> (i32, i32) {
    %c0_i32 = arith.constant 0 : i32
    %c0_i32_0 = arith.constant 0 : i32
    return %arg0, %c0_i32 : i32, i32
  }
}

module attributes {stable_mosaic.version = 11 : i64} {
  func.func @eig_head_kernel(%arg0: i32, %arg1: memref<8x64xf32, #tpu.memory_space<vmem>>, %arg2: memref<64x128xf32, #tpu.memory_space<vmem>>, %arg3: memref<128x128xf32, #tpu.memory_space<vmem>>, %arg4: memref<128x128xf32, #tpu.memory_space<vmem>>, %arg5: memref<8x128xf32, #tpu.memory_space<vmem>>, %arg6: memref<1x128xf32, #tpu.memory_space<vmem>>, %arg7: memref<8x128xf32, #tpu.memory_space<vmem>>) attributes {dimension_semantics = [#tpu.dimension_semantics<parallel>], iteration_bounds = array<i64: 1>, scalar_prefetch = 0 : i64, scratch_operands = 0 : i64, tpu.core_type = #tpu.core_type<tc>, window_params = [{transform_indices = @transform_0, window_bounds = array<i64: 8, 64>}, {pipeline_mode = #tpu.pipeline_mode<synchronous>, transform_indices = @transform_1, window_bounds = array<i64: 64, 128>}, {pipeline_mode = #tpu.pipeline_mode<synchronous>, transform_indices = @transform_2, window_bounds = array<i64: 128, 128>}, {pipeline_mode = #tpu.pipeline_mode<synchronous>, transform_indices = @transform_3, window_bounds = array<i64: 128, 128>}, {pipeline_mode = #tpu.pipeline_mode<synchronous>, transform_indices = @transform_4, window_bounds = array<i64: 8, 128>}, {pipeline_mode = #tpu.pipeline_mode<synchronous>, transform_indices = @transform_5, window_bounds = array<i64: 1, 128>}, {transform_indices = @transform_6, window_bounds = array<i64: 8, 128>}]} {
    %c0 = arith.constant 0 : index
    %c0_0 = arith.constant 0 : index
    %0 = vector.load %arg5[%c0, %c0_0] : memref<8x128xf32, #tpu.memory_space<vmem>>, vector<8x128xf32>
    %1 = vector.extract_strided_slice %0 {offsets = [0, 0], sizes = [1, 128], strides = [1, 1]} : vector<8x128xf32> to vector<1x128xf32>
    %2 = vector.extract_strided_slice %0 {offsets = [1, 0], sizes = [1, 128], strides = [1, 1]} : vector<8x128xf32> to vector<1x128xf32>
    %3 = vector.extract_strided_slice %0 {offsets = [2, 0], sizes = [1, 128], strides = [1, 1]} : vector<8x128xf32> to vector<1x128xf32>
    %4 = vector.extract_strided_slice %0 {offsets = [3, 0], sizes = [1, 128], strides = [1, 1]} : vector<8x128xf32> to vector<1x128xf32>
    %5 = vector.extract_strided_slice %0 {offsets = [4, 0], sizes = [1, 128], strides = [1, 1]} : vector<8x128xf32> to vector<1x128xf32>
    %6 = vector.extract_strided_slice %0 {offsets = [5, 0], sizes = [1, 128], strides = [1, 1]} : vector<8x128xf32> to vector<1x128xf32>
    %c0_1 = arith.constant 0 : index
    %c0_2 = arith.constant 0 : index
    %7 = vector.load %arg1[%c0_1, %c0_2] : memref<8x64xf32, #tpu.memory_space<vmem>>, vector<8x64xf32>
    %c0_3 = arith.constant 0 : index
    %c0_4 = arith.constant 0 : index
    %8 = vector.load %arg2[%c0_3, %c0_4] : memref<64x128xf32, #tpu.memory_space<vmem>>, vector<64x128xf32>
    %cst = arith.constant dense<0.000000e+00> : vector<8x128xf32>
    %9 = tpu.matmul %7, %8, %cst {dimension_numbers = #tpu.dot_dimension_numbers<[1], [0], [0], [1], [0, 0, 1, 1], [], []>} : vector<8x64xf32>, vector<64x128xf32>, vector<8x128xf32> -> vector<8x128xf32>
    %10 = vector.broadcast %1 : vector<1x128xf32> to vector<8x128xf32>
    %11 = arith.addf %9, %10 : vector<8x128xf32>
    %cst_5 = arith.constant dense<0.000000e+00> : vector<8xf32>
    %12 = vector.multi_reduction <add>, %11, %cst_5 [1] : vector<8x128xf32> to vector<8xf32>
    %13 = vector.shape_cast %12 : vector<8xf32> to vector<8x1xf32>
    %14 = arith.mulf %11, %11 : vector<8x128xf32>
    %cst_6 = arith.constant dense<0.000000e+00> : vector<8xf32>
    %15 = vector.multi_reduction <add>, %14, %cst_6 [1] : vector<8x128xf32> to vector<8xf32>
    %16 = vector.shape_cast %15 : vector<8xf32> to vector<8x1xf32>
    %cst_7 = arith.constant 1.562500e-02 : f32
    %17 = vector.broadcast %cst_7 : f32 to vector<8x1xf32>
    %18 = arith.mulf %13, %17 : vector<8x1xf32>
    %cst_8 = arith.constant 1.562500e-02 : f32
    %19 = vector.broadcast %cst_8 : f32 to vector<8x1xf32>
    %20 = arith.mulf %16, %19 : vector<8x1xf32>
    %21 = arith.mulf %18, %18 : vector<8x1xf32>
    %22 = arith.subf %20, %21 : vector<8x1xf32>
    %cst_9 = arith.constant 0.000000e+00 : f32
    %23 = vector.broadcast %cst_9 : f32 to vector<8x1xf32>
    %24 = arith.maximumf %22, %23 : vector<8x1xf32>
    %25 = vector.broadcast %18 : vector<8x1xf32> to vector<8x128xf32>
    %26 = arith.subf %11, %25 : vector<8x128xf32>
    %cst_10 = arith.constant 9.99999974E-6 : f32
    %27 = vector.broadcast %cst_10 : f32 to vector<8x1xf32>
    %28 = arith.addf %24, %27 : vector<8x1xf32>
    %29 = math.rsqrt %28 : vector<8x1xf32>
    %30 = vector.broadcast %29 : vector<8x1xf32> to vector<8x128xf32>
    %31 = arith.mulf %26, %30 : vector<8x128xf32>
    %32 = vector.broadcast %2 : vector<1x128xf32> to vector<8x128xf32>
    %33 = arith.mulf %31, %32 : vector<8x128xf32>
    %34 = vector.broadcast %3 : vector<1x128xf32> to vector<8x128xf32>
    %35 = arith.addf %33, %34 : vector<8x128xf32>
    %cst_11 = arith.constant 5.000000e-01 : f32
    %36 = vector.broadcast %cst_11 : f32 to vector<8x128xf32>
    %37 = arith.mulf %36, %35 : vector<8x128xf32>
    %cst_12 = arith.constant 0.707106769 : f32
    %38 = vector.broadcast %cst_12 : f32 to vector<8x128xf32>
    %39 = arith.mulf %35, %38 : vector<8x128xf32>
    %40 = math.erf %39 : vector<8x128xf32>
    %cst_13 = arith.constant 1.000000e+00 : f32
    %41 = vector.broadcast %cst_13 : f32 to vector<8x128xf32>
    %42 = arith.addf %41, %40 : vector<8x128xf32>
    %43 = arith.mulf %37, %42 : vector<8x128xf32>
    %c0_14 = arith.constant 0 : index
    %c0_15 = arith.constant 0 : index
    %44 = vector.load %arg3[%c0_14, %c0_15] : memref<128x128xf32, #tpu.memory_space<vmem>>, vector<128x128xf32>
    %cst_16 = arith.constant dense<0.000000e+00> : vector<8x128xf32>
    %45 = tpu.matmul %43, %44, %cst_16 {dimension_numbers = #tpu.dot_dimension_numbers<[1], [0], [0], [1], [0, 0, 1, 1], [], []>} : vector<8x128xf32>, vector<128x128xf32>, vector<8x128xf32> -> vector<8x128xf32>
    %46 = vector.broadcast %4 : vector<1x128xf32> to vector<8x128xf32>
    %47 = arith.addf %45, %46 : vector<8x128xf32>
    %cst_17 = arith.constant dense<0.000000e+00> : vector<8xf32>
    %48 = vector.multi_reduction <add>, %47, %cst_17 [1] : vector<8x128xf32> to vector<8xf32>
    %49 = vector.shape_cast %48 : vector<8xf32> to vector<8x1xf32>
    %50 = arith.mulf %47, %47 : vector<8x128xf32>
    %cst_18 = arith.constant dense<0.000000e+00> : vector<8xf32>
    %51 = vector.multi_reduction <add>, %50, %cst_18 [1] : vector<8x128xf32> to vector<8xf32>
    %52 = vector.shape_cast %51 : vector<8xf32> to vector<8x1xf32>
    %cst_19 = arith.constant 1.562500e-02 : f32
    %53 = vector.broadcast %cst_19 : f32 to vector<8x1xf32>
    %54 = arith.mulf %49, %53 : vector<8x1xf32>
    %cst_20 = arith.constant 1.562500e-02 : f32
    %55 = vector.broadcast %cst_20 : f32 to vector<8x1xf32>
    %56 = arith.mulf %52, %55 : vector<8x1xf32>
    %57 = arith.mulf %54, %54 : vector<8x1xf32>
    %58 = arith.subf %56, %57 : vector<8x1xf32>
    %cst_21 = arith.constant 0.000000e+00 : f32
    %59 = vector.broadcast %cst_21 : f32 to vector<8x1xf32>
    %60 = arith.maximumf %58, %59 : vector<8x1xf32>
    %61 = vector.broadcast %54 : vector<8x1xf32> to vector<8x128xf32>
    %62 = arith.subf %47, %61 : vector<8x128xf32>
    %cst_22 = arith.constant 9.99999974E-6 : f32
    %63 = vector.broadcast %cst_22 : f32 to vector<8x1xf32>
    %64 = arith.addf %60, %63 : vector<8x1xf32>
    %65 = math.rsqrt %64 : vector<8x1xf32>
    %66 = vector.broadcast %65 : vector<8x1xf32> to vector<8x128xf32>
    %67 = arith.mulf %62, %66 : vector<8x128xf32>
    %68 = vector.broadcast %5 : vector<1x128xf32> to vector<8x128xf32>
    %69 = arith.mulf %67, %68 : vector<8x128xf32>
    %70 = vector.broadcast %6 : vector<1x128xf32> to vector<8x128xf32>
    %71 = arith.addf %69, %70 : vector<8x128xf32>
    %cst_23 = arith.constant 5.000000e-01 : f32
    %72 = vector.broadcast %cst_23 : f32 to vector<8x128xf32>
    %73 = arith.mulf %72, %71 : vector<8x128xf32>
    %cst_24 = arith.constant 0.707106769 : f32
    %74 = vector.broadcast %cst_24 : f32 to vector<8x128xf32>
    %75 = arith.mulf %71, %74 : vector<8x128xf32>
    %76 = math.erf %75 : vector<8x128xf32>
    %cst_25 = arith.constant 1.000000e+00 : f32
    %77 = vector.broadcast %cst_25 : f32 to vector<8x128xf32>
    %78 = arith.addf %77, %76 : vector<8x128xf32>
    %79 = arith.mulf %73, %78 : vector<8x128xf32>
    %80 = arith.addf %79, %43 : vector<8x128xf32>
    %c0_26 = arith.constant 0 : index
    %c0_27 = arith.constant 0 : index
    %81 = vector.load %arg4[%c0_26, %c0_27] : memref<128x128xf32, #tpu.memory_space<vmem>>, vector<128x128xf32>
    %cst_28 = arith.constant dense<0.000000e+00> : vector<8x128xf32>
    %82 = tpu.matmul %80, %81, %cst_28 {dimension_numbers = #tpu.dot_dimension_numbers<[1], [0], [0], [1], [0, 0, 1, 1], [], []>} : vector<8x128xf32>, vector<128x128xf32>, vector<8x128xf32> -> vector<8x128xf32>
    %c0_29 = arith.constant 0 : index
    %c0_30 = arith.constant 0 : index
    %83 = vector.load %arg6[%c0_29, %c0_30] : memref<1x128xf32, #tpu.memory_space<vmem>>, vector<1x128xf32>
    %84 = vector.broadcast %83 : vector<1x128xf32> to vector<8x128xf32>
    %85 = arith.addf %82, %84 : vector<8x128xf32>
    %c0_31 = arith.constant 0 : index
    %c0_32 = arith.constant 0 : index
    %86 = vector.load %arg7[%c0_31, %c0_32] : memref<8x128xf32, #tpu.memory_space<vmem>>, vector<8x128xf32>
    tpu.vector_store %arg7[%c0_31, %c0_32], %85 {strides = array<i32>} : memref<8x128xf32, #tpu.memory_space<vmem>>, vector<8x128xf32>,
    return
  }
  func.func @transform_0(%arg0: i32) -> (i32, i32) {
    %c0_i32 = arith.constant 0 : i32
    %c0_i32_0 = arith.constant 0 : i32
    return %arg0, %c0_i32 : i32, i32
  }
  func.func @transform_1(%arg0: i32) -> (i32, i32) {
    %c0_i32 = arith.constant 0 : i32
    %c0_i32_0 = arith.constant 0 : i32
    %c0_i32_1 = arith.constant 0 : i32
    return %c0_i32, %c0_i32_0 : i32, i32
  }
  func.func @transform_2(%arg0: i32) -> (i32, i32) {
    %c0_i32 = arith.constant 0 : i32
    %c0_i32_0 = arith.constant 0 : i32
    %c0_i32_1 = arith.constant 0 : i32
    return %c0_i32, %c0_i32_0 : i32, i32
  }
  func.func @transform_3(%arg0: i32) -> (i32, i32) {
    %c0_i32 = arith.constant 0 : i32
    %c0_i32_0 = arith.constant 0 : i32
    %c0_i32_1 = arith.constant 0 : i32
    return %c0_i32, %c0_i32_0 : i32, i32
  }
  func.func @transform_4(%arg0: i32) -> (i32, i32) {
    %c0_i32 = arith.constant 0 : i32
    %c0_i32_0 = arith.constant 0 : i32
    %c0_i32_1 = arith.constant 0 : i32
    return %c0_i32, %c0_i32_0 : i32, i32
  }
  func.func @transform_5(%arg0: i32) -> (i32, i32) {
    %c0_i32 = arith.constant 0 : i32
    %c0_i32_0 = arith.constant 0 : i32
    %c0_i32_1 = arith.constant 0 : i32
    return %c0_i32, %c0_i32_0 : i32, i32
  }
  func.func @transform_6(%arg0: i32) -> (i32, i32) {
    %c0_i32 = arith.constant 0 : i32
    %c0_i32_0 = arith.constant 0 : i32
    return %arg0, %c0_i32 : i32, i32
  }
}

</mosaic_0001>

<bundles_post_ra>
// kernel: tpu_custom_call.1
= control target key start
LH: loop header
LB: loop body
LE: loop exit
PB: predicated region body
PF: predicated region fallthrough
CT: control target
= control target key end

     0   :  { %11 = vsyncpa [#allocation3], 0  ;;  %s621_s0 = inlined_call_operand.hbm [shape: f32[8,64], index: 0, kind: input, shape index: {}]   ;;  %s622_s1 = inlined_call_operand.hbm [shape: f32[64,128], index: 1, kind: input, shape index: {}]   ;;  %s623_s2 = inlined_call_operand.hbm [shape: f32[128,128], index: 2, kind: input, shape index: {}]   ;;  %s624_s3 = inlined_call_operand.hbm [shape: f32[128,128], index: 3, kind: input, shape index: {}]   ;;  %s625_s4 = inlined_call_operand.hbm [shape: f32[8,128], index: 4, kind: input, shape index: {}]   ;;  %s626_s5 = inlined_call_operand.vmem [shape: f32[1,128], index: 5, kind: input, shape index: {}]   ;;  %s627_s6 = inlined_call_operand.hbm [shape: f32[8,128], index: 6, kind: output, shape index: {}]  }
   0x1   :  { %12 = vsyncpa [#allocation6], 0 }
   0x2   :  { %13 = vsyncpa [#allocation9], 0  ;;  %s30_s23 = sshll.u32 %s622_s1, 4  ;;  %s31_s23 = int_to_ptr.hbm [resolvable:$true] %s30_s23 }
   0x3   :  { %14 = vsyncpa [#allocation4], 0  ;;  %s545_s24 = smov [#allocation5]   ;;  %s56_s28 = sshll.u32 %s624_s3, 4  ;;  %s57_s28 = int_to_ptr.hbm [resolvable:$true] %s56_s28 }
   0x4   :  { %s32_s25 = sshll.u32 %s545_s24, 4  ;;  %s546_s29 = smov 128   ;;  %s33_s25 = int_to_ptr.vmem [resolvable:$true] %s32_s25 }
   0x5   :  { %s547_s30 = smov 8   ;;  %s548_s7 = smov [#allocation8]  }
   0x6   :  { %38 = dma.hbm_to_vmem [thread:$0]  %s31_s23, 1024, %s33_s25, [#allocation6], %s546_s29, %s546_s29, %s547_s30  }
   0x7   :  { %s58_s8 = sshll.u32 %s548_s7, 4  ;;  %s20_s11 = sshll.u32 %s621_s0, 4  ;;  %s59_s8 = int_to_ptr.vmem [resolvable:$true] %s58_s8  ;;  %s21_s11 = int_to_ptr.hbm [resolvable:$true] %s20_s11 }
   0x8   :  { %64 = dma.hbm_to_vmem [thread:$0]  %s57_s28, 2048, %s59_s8, [#allocation9], %s546_s29, %s546_s29, %s547_s30  }
   0x9   :  { %s43_s13 = sshll.u32 %s623_s2, 4  ;;  %s549_s14 = smov [#allocation2]   ;;  %s44_s13 = int_to_ptr.hbm [resolvable:$true] %s43_s13 }
   0xa   :  { %s22_s15 = sshll.u32 %s549_s14, 4  ;;  %s550_s3 = smov [#allocation7]   ;;  %s23_s15 = int_to_ptr.vmem [resolvable:$true] %s22_s15 }
   0xb   :  { %25 = dma.hbm_to_vmem [thread:$0]  %s21_s11, 128, %s23_s15, [#allocation3]  }
   0xc   :  { %s45_s16 = sshll.u32 %s550_s3, 4  ;;  %s70_s19 = sshll.u32 %s625_s4, 4  ;;  %s46_s16 = int_to_ptr.vmem [resolvable:$true] %s45_s16  ;;  %s71_s19 = int_to_ptr.hbm [resolvable:$true] %s70_s19 }
   0xd   :  { %51 = dma.hbm_to_vmem [thread:$0]  %s44_s13, 2048, %s46_s16, [#allocation6], %s546_s29, %s546_s29, %s547_s30  }
   0xe   :  { %s551_s0 = smov [#allocation10]  }
   0xf   :  { %s72_s20 = sshll.u32 %s551_s0, 4  ;;  %s73_s20 = int_to_ptr.vmem [resolvable:$true] %s72_s20 }
  0x10   :  { %75 = dma.hbm_to_vmem [thread:$0]  %s71_s19, 128, %s73_s20, [#allocation9]  }
  0x11   :  { %537 = dma.done.wait [#allocation3], 128  }
  0x12   :  { %538 = vsyncadd [#allocation3], 4294967168 }
  0x13   :  { %539 = dma.done.wait [#allocation6], 3072  }
  0x14   :  { %540 = vsyncadd [#allocation6], 4294964224 }
  0x15   :  { %541 = dma.done.wait [#allocation9], 2176  }
  0x16   :  { %542 = vsyncadd [#allocation9], 4294965120  ;;  %v107_v0 = vld [vmem:[#allocation5 + $0x38] sm:$0xff]  ;;  %v106_v1 = vld [vmem:[#allocation5 + $0x30] sm:$0xff]  ;;  %vm109_vm0 = vcmask 523264   ;;  %s552_s21 = smov [#allocation11]  }
  0x17   :  { %121 = vmatpush.msra.mxu0 %v107_v0  ;;  %v105_v2 = vld [vmem:[#allocation5 + $0x28] sm:$0xff]  ;;  %v104_v3 = vld [vmem:[#allocation5 + $0x20] sm:$0xff]  ;;  %v103_v4 = vld [vmem:[#allocation5 + $0x18] sm:$0xff]  ;;  %s359_s22 = sshll.u32 %s552_s21, 4  ;;  %s361_s25 = sshll.u32 %s627_s6, 4  ;;  %s360_s22 = int_to_ptr.vmem [resolvable:$true] %s359_s22  ;;  %s362_s25 = int_to_ptr.hbm [resolvable:$true] %s361_s25 }
  0x18   :  { %v102_v5 = vld [vmem:[#allocation5 + $0x10] sm:$0xff]  ;;  %v101_v6 = vld [vmem:[#allocation5 + $0x8] sm:$0xff]  ;;  %v100_v7 = vld [vmem:[#allocation5] sm:$0xff] }
  0x19   :  { %122 = vmatpush.msra.mxu0 %v106_v1  ;;  %v99_v8 = vld [vmem:[#allocation2] sm:$0xff]  ;;  %v603_v9 = vld [vmem:[#allocation10] sm:$0xff]  ;;  %v218_v16 = vld [vmem:[#allocation7 + $0x70] sm:$0xff] }
  0x1a   :  { %v108_v10 = vperm.slane %v603_v9, 0  ;;  %v219_v15 = vld [vmem:[#allocation7 + $0x78] sm:$0xff]  ;;  %v217_v17 = vld [vmem:[#allocation7 + $0x68] sm:$0xff]  ;;  %v216_v18 = vld [vmem:[#allocation7 + $0x60] sm:$0xff]  ;;  %v156_v45 = vperm.slane %v603_v9, 1  ;;  %v158_v48 = vperm.slane %v603_v9, 2 }
  0x1b   :  { %123 = vmatpush.msra.mxu0 %v105_v2  ;;  %221 = vmatpush.msra.mxu1 %v219_v15  ;;  %v215_v20 = vld [vmem:[#allocation7 + $0x58] sm:$0xff]  ;;  %v214_v22 = vld [vmem:[#allocation7 + $0x50] sm:$0xff]  ;;  %v213_v25 = vld [vmem:[#allocation7 + $0x48] sm:$0xff] }
  0x1c   :  { %v212_v27 = vld [vmem:[#allocation7 + $0x40] sm:$0xff]  ;;  %v211_v29 = vld [vmem:[#allocation7 + $0x38] sm:$0xff]  ;;  %v210_v31 = vld [vmem:[#allocation7 + $0x30] sm:$0xff] }
  0x1d   :  { %124 = vmatpush.msra.mxu0 %v104_v3  ;;  %222 = vmatpush.msra.mxu1 %v218_v16  ;;  %v209_v32 = vld [vmem:[#allocation7 + $0x28] sm:$0xff]  ;;  %v208_v33 = vld [vmem:[#allocation7 + $0x20] sm:$0xff]  ;;  %v207_v34 = vld [vmem:[#allocation7 + $0x18] sm:$0xff] }
  0x1e   :  { %v206_v37 = vld [vmem:[#allocation7 + $0x10] sm:$0xff]  ;;  %v205_v39 = vld [vmem:[#allocation7 + $0x8] sm:$0xff]  ;;  %v204_v41 = vld [vmem:[#allocation7] sm:$0xff] }
  0x1f   :  { %125 = vmatpush.msra.mxu0 %v103_v4  ;;  %223 = vmatpush.msra.mxu1 %v217_v17 }
  0x21   :  { %126 = vmatpush.msra.mxu0 %v102_v5  ;;  %224 = vmatpush.msra.mxu1 %v216_v18 }
  0x23   :  { %127 = vmatpush.msra.mxu0 %v101_v6  ;;  %225 = vmatpush.msra.mxu1 %v215_v20 }
  0x25   :  { %128 = vmatpush.msra.mxu0 %v100_v7  ;;  %226 = vmatpush.msra.mxu1 %v214_v22 }
  0x26   :  { %373 = vmatmul.msk.f32.vlgmr.msra.gmra.mxu0 %vm109_vm0, %v99_v8 }
  0x27   :  { %227 = vmatpush.msra.mxu1 %v213_v25 }
  0x29   :  { %228 = vmatpush.msra.mxu1 %v212_v27  ;;  %v220_v27 = vperm.slane %v603_v9, 3 }
  0x2b   :  { %229 = vmatpush.msra.mxu1 %v211_v29 }
  0x2d   :  { %230 = vmatpush.msra.mxu1 %v210_v31 }
  0x2f   :  { %231 = vmatpush.msra.mxu1 %v209_v32  ;;  %v328_v32 = vld [vmem:[#allocation8 + $0x78] sm:$0xff] }
  0x30   :  { %333 = vmatpush.msra.mxu2 %v328_v32 }
  0x31   :  { %232 = vmatpush.msra.mxu1 %v208_v33  ;;  %v327_v33 = vld [vmem:[#allocation8 + $0x70] sm:$0xff] }
  0x32   :  { %334 = vmatpush.msra.mxu2 %v327_v33 }
  0x33   :  { %233 = vmatpush.msra.mxu1 %v207_v34  ;;  %v326_v34 = vld [vmem:[#allocation8 + $0x68] sm:$0xff] }
  0x34   :  { %335 = vmatpush.msra.mxu2 %v326_v34 }
  0x35   :  { %234 = vmatpush.msra.mxu1 %v206_v37 }
  0x37   :  { %235 = vmatpush.msra.mxu1 %v205_v39 }
  0x39   :  { %236 = vmatpush.msra.mxu1 %v204_v41  ;;  %v323_v41 = vld [vmem:[#allocation8 + $0x50] sm:$0xff] }
  0xa3   :  { %v130_v11 = vpop.f32.mrf.mxu0 }
  0xa4   :  { %v131_v12 = vadd.f32 %v130_v11, %v108_v10 }
  0xa6   :  { %133 = vadd.xlane.f32.xlu0 %v131_v12  ;;  %v135_v13 = vmul.f32 %v131_v12, %v131_v12 }
  0xae   :  { %136 = vadd.xlane.f32.xlu0 %v135_v13 }
 0x119   :  { %v134_v14 = vpop.xlane.xlu0 %133 }
 0x11a   :  { %v138_v19 = vmul.f32 0.015625, %v134_v14 }
 0x11c   :  { %v140_v23 = vmul.f32 %v138_v19, %v138_v19  ;;  %v143_v44 = vsub.f32 %v131_v12, %v138_v19 }
 0x121   :  { %v137_v21 = vpop.xlane.xlu0 %136 }
 0x122   :  { %v139_v24 = vmul.f32 0.015625, %v137_v21 }
 0x124   :  { %v141_v26 = vsub.f32 %v139_v24, %v140_v23 }
 0x126   :  { %v142_v28 = vmax.f32 %v141_v26, 0.0 }
 0x128   :  { %v144_v30 = vadd.f32 1e-05, %v142_v28 }
 0x12a   :  { %385 = vrsqrt.f32 %v144_v30  ;;  %vm151_vm2 = vweird.f32 %v144_v30 }
 0x130   :  { %v386_v35 = vpop.eup %385 }
 0x131   :  { %v146_v36 = vmul.f32 %v386_v35, %v144_v30  ;;  %vm152_vm1 = vweird.f32 %v386_v35 }
 0x132   :  { %vm153_vm3 = vmor %vm151_vm2, %vm152_vm1 }
 0x133   :  { %v147_v38 = vmul.f32 %v386_v35, %v146_v36  ;;  %v325_v36 = vld [vmem:[#allocation8 + $0x60] sm:$0xff] }
 0x134   :  { %336 = vmatpush.msra.mxu2 %v325_v36 }
 0x135   :  { %v148_v40 = vmul.f32 0.5, %v147_v38  ;;  %v324_v38 = vld [vmem:[#allocation8 + $0x58] sm:$0xff] }
 0x136   :  { %337 = vmatpush.msra.mxu2 %v324_v38 }
 0x137   :  { %v149_v42 = vsub.f32 1.5, %v148_v40 }
 0x138   :  { %338 = vmatpush.msra.mxu2 %v323_v41 }
 0x139   :  { %v150_v43 = vmul.f32 %v386_v35, %v149_v42 }
 0x13b   :  { %v154_v46 = vsel %vm153_vm3, %v386_v35, %v150_v43  ;;  %v322_v43 = vld [vmem:[#allocation8 + $0x48] sm:$0xff] }
 0x13c   :  { %v155_v47 = vmul.f32 %v154_v46, %v143_v44  ;;  %339 = vmatpush.msra.mxu2 %v322_v43 }
 0x13e   :  { %v157_v49 = vmul.f32 %v156_v45, %v155_v47  ;;  %v321_v45 = vld [vmem:[#allocation8 + $0x40] sm:$0xff]  ;;  %v320_v47 = vld [vmem:[#allocation8 + $0x38] sm:$0xff] }
 0x13f   :  { %340 = vmatpush.msra.mxu2 %v321_v45  ;;  %v384_v45 = vld [vmem:[%s626_s5] ss:$0 sm:$0xff] }
 0x140   :  { %v159_v50 = vadd.f32 %v158_v48, %v157_v49  ;;  %v319_v48 = vld [vmem:[#allocation8 + $0x30] sm:$0xff]  ;;  %v318_v49 = vld [vmem:[#allocation8 + $0x28] sm:$0xff] }
 0x141   :  { %341 = vmatpush.msra.mxu2 %v320_v47 }
 0x142   :  { %v161_v51 = vmul.f32 0.70710677, %v159_v50  ;;  %v160_v24 = vmul.f32 0.5, %v159_v50  ;;  %v317_v50 = vld [vmem:[#allocation8 + $0x20] sm:$0xff] }
 0x143   :  { %342 = vmatpush.msra.mxu2 %v319_v48 }
 0x144   :  { %v162_v52 = vmul.f32 %v161_v51, %v161_v51 }
 0x145   :  { %343 = vmatpush.msra.mxu2 %v318_v49 }
 0x146   :  { %v163_v53 = vmin.f32 %v162_v52, 16.0 }
 0x147   :  { %344 = vmatpush.msra.mxu2 %v317_v50 }
 0x148   :  { %v164_v54 = vmul.f32 2.1237322e-06, %v163_v53  ;;  %v175_v55 = vmul.f32 3.8918573e-05, %v163_v53 }
 0x14a   :  { %v165_v56 = vadd.f32 0.00028619796, %v164_v54  ;;  %v176_v57 = vadd.f32 0.001143296, %v175_v55  ;;  %v315_v55 = vld [vmem:[#allocation8 + $0x10] sm:$0xff] }
 0x14c   :  { %v166_v58 = vmul.f32 %v165_v56, %v163_v53  ;;  %v177_v59 = vmul.f32 %v176_v57, %v163_v53  ;;  %v314_v57 = vld [vmem:[#allocation8 + $0x8] sm:$0xff] }
 0x14e   :  { %v178_v60 = vadd.f32 0.014752088, %v177_v59  ;;  %v167_v61 = vadd.f32 0.0036580483, %v166_v58  ;;  %v313_v59 = vld [vmem:[#allocation8] sm:$0xff] }
 0x150   :  { %v179_v62 = vmul.f32 %v178_v60, %v163_v53  ;;  %v168_v0 = vmul.f32 %v167_v61, %v163_v53 }
 0x152   :  { %v180_v63 = vadd.f32 0.112945676, %v179_v62  ;;  %v169_v3 = vadd.f32 0.05243302, %v168_v0  ;;  %v264_v62 = vperm.slane %v603_v9, 4 }
 0x154   :  { %v181_v1 = vmul.f32 %v180_v63, %v163_v53  ;;  %v170_v6 = vmul.f32 %v169_v3, %v163_v53 }
 0x156   :  { %v182_v2 = vadd.f32 0.4994258, %v181_v1  ;;  %v171_v7 = vadd.f32 0.18741608, %v170_v6  ;;  %v266_v1 = vperm.slane %v603_v9, 5 }
 0x158   :  { %v183_v4 = vmul.f32 %v182_v2, %v163_v53  ;;  %v172_v10 = vmul.f32 %v171_v7, %v163_v53  ;;  %v316_v53 = vld [vmem:[#allocation8 + $0x18] sm:$0xff] }
 0x159   :  { %345 = vmatpush.msra.mxu2 %v316_v53 }
 0x15a   :  { %v184_v5 = vadd.f32 1.0, %v183_v4  ;;  %v173_v14 = vadd.f32 1.1283791, %v172_v10 }
 0x15b   :  { %346 = vmatpush.msra.mxu2 %v315_v55 }
 0x15c   :  { %387 = vrcp.f32 %v184_v5  ;;  %v196_v13 = vand.u32 2147483648, %v184_v5  ;;  %v194_v16 = vand.u32 2147483647, %v184_v5  ;;  %vm190_vm5 = vweird.f32 %v184_v5 }
 0x15d   :  { %v174_v19 = vmul.f32 %v173_v14, %v161_v51  ;;  %347 = vmatpush.msra.mxu2 %v314_v57 }
 0x15e   :  { %v197_v18 = vor.u32 1.1754944e-38, %v196_v13  ;;  %vm195_vm7 = vcmp.eq.f32.partialorder %v194_v16, 8.507059e+37 }
 0x15f   :  { %348 = vmatpush.msra.mxu2 %v313_v59 }
 0x162   :  { %v388_v8 = vpop.eup %387 }
 0x163   :  { %v186_v11 = vmul.f32 %v388_v8, %v184_v5  ;;  %vm191_vm4 = vweird.f32 %v388_v8 }
 0x164   :  { %vm192_vm6 = vmor %vm190_vm5, %vm191_vm4 }
 0x165   :  { %v187_v12 = vsub.f32 1.0, %v186_v11 }
 0x167   :  { %v188_v15 = vmul.f32 %v388_v8, %v187_v12 }
 0x169   :  { %v189_v17 = vadd.f32 %v388_v8, %v188_v15 }
 0x16b   :  { %v193_v20 = vsel %vm192_vm6, %v388_v8, %v189_v17 }
 0x16c   :  { %v198_v21 = vsel %vm195_vm7, %v197_v18, %v193_v20 }
 0x16d   :  { %v199_v22 = vmul.f32 %v198_v21, %v174_v19 }
 0x16f   :  { %v374_v23 = vclamps-f32 %v199_v22, 1.0 }
 0x171   :  { %v202_v25 = vadd.f32 1.0, %v374_v23 }
 0x173   :  { %v608_v26 = vmul.f32 %v202_v25, %v160_v24 }
 0x175   :  { %237 = vmatmul.f32.vlgmr.msra.gmra.mxu1 %v608_v26 }
 0x1f2   :  { %v238_v28 = vpop.f32.mrf.mxu1 }
 0x1f3   :  { %v239_v29 = vadd.f32 %v238_v28, %v220_v27 }
 0x1f5   :  { %241 = vadd.xlane.f32.xlu1 %v239_v29  ;;  %v243_v30 = vmul.f32 %v239_v29, %v239_v29 }
 0x1fd   :  { %244 = vadd.xlane.f32.xlu1 %v243_v30 }
 0x268   :  { %v242_v31 = vpop.xlane.xlu1 %241 }
 0x269   :  { %v246_v35 = vmul.f32 0.015625, %v242_v31 }
 0x26b   :  { %v248_v39 = vmul.f32 %v246_v35, %v246_v35  ;;  %v251_v61 = vsub.f32 %v239_v29, %v246_v35 }
 0x270   :  { %v245_v37 = vpop.xlane.xlu1 %244 }
 0x271   :  { %v247_v40 = vmul.f32 0.015625, %v245_v37 }
 0x273   :  { %v249_v42 = vsub.f32 %v247_v40, %v248_v39 }
 0x275   :  { %v250_v44 = vmax.f32 %v249_v42, 0.0 }
 0x277   :  { %v252_v46 = vadd.f32 1e-05, %v250_v44 }
 0x279   :  { %389 = vrsqrt.f32 %v252_v46  ;;  %vm259_vm9 = vweird.f32 %v252_v46 }
 0x27f   :  { %v390_v51 = vpop.eup %389 }
 0x280   :  { %v254_v52 = vmul.f32 %v390_v51, %v252_v46  ;;  %vm260_vm8 = vweird.f32 %v390_v51 }
 0x281   :  { %vm261_vm10 = vmor %vm259_vm9, %vm260_vm8 }
 0x282   :  { %v255_v54 = vmul.f32 %v390_v51, %v254_v52 }
 0x284   :  { %v256_v56 = vmul.f32 0.5, %v255_v54 }
 0x286   :  { %v257_v58 = vsub.f32 1.5, %v256_v56 }
 0x288   :  { %v258_v60 = vmul.f32 %v390_v51, %v257_v58 }
 0x28a   :  { %v262_v63 = vsel %vm261_vm10, %v390_v51, %v258_v60 }
 0x28b   :  { %v263_v0 = vmul.f32 %v262_v63, %v251_v61 }
 0x28d   :  { %v265_v2 = vmul.f32 %v264_v62, %v263_v0 }
 0x28f   :  { %v267_v3 = vadd.f32 %v266_v1, %v265_v2 }
 0x291   :  { %v269_v4 = vmul.f32 0.70710677, %v267_v3  ;;  %v268_v41 = vmul.f32 0.5, %v267_v3 }
 0x293   :  { %v270_v5 = vmul.f32 %v269_v4, %v269_v4 }
 0x295   :  { %v271_v6 = vmin.f32 %v270_v5, 16.0 }
 0x297   :  { %v272_v7 = vmul.f32 2.1237322e-06, %v271_v6  ;;  %v283_v8 = vmul.f32 3.8918573e-05, %v271_v6 }
 0x299   :  { %v273_v10 = vadd.f32 0.00028619796, %v272_v7  ;;  %v284_v11 = vadd.f32 0.001143296, %v283_v8 }
 0x29b   :  { %v274_v12 = vmul.f32 %v273_v10, %v271_v6  ;;  %v285_v13 = vmul.f32 %v284_v11, %v271_v6 }
 0x29d   :  { %v286_v14 = vadd.f32 0.014752088, %v285_v13  ;;  %v275_v15 = vadd.f32 0.0036580483, %v274_v12 }
 0x29f   :  { %v287_v16 = vmul.f32 %v286_v14, %v271_v6  ;;  %v276_v18 = vmul.f32 %v275_v15, %v271_v6 }
 0x2a1   :  { %v288_v17 = vadd.f32 0.112945676, %v287_v16  ;;  %v277_v21 = vadd.f32 0.05243302, %v276_v18 }
 0x2a3   :  { %v289_v19 = vmul.f32 %v288_v17, %v271_v6  ;;  %v278_v23 = vmul.f32 %v277_v21, %v271_v6 }
 0x2a5   :  { %v290_v20 = vadd.f32 0.4994258, %v289_v19  ;;  %v279_v24 = vadd.f32 0.18741608, %v278_v23 }
 0x2a7   :  { %v291_v9 = vmul.f32 %v290_v20, %v271_v6  ;;  %v280_v27 = vmul.f32 %v279_v24, %v271_v6 }
 0x2a9   :  { %v292_v22 = vadd.f32 1.0, %v291_v9  ;;  %v281_v31 = vadd.f32 1.1283791, %v280_v27 }
 0x2ab   :  { %391 = vrcp.f32 %v292_v22  ;;  %v304_v30 = vand.u32 2147483648, %v292_v22  ;;  %v302_v33 = vand.u32 2147483647, %v292_v22  ;;  %vm298_vm12 = vweird.f32 %v292_v22 }
 0x2ac   :  { %v282_v36 = vmul.f32 %v281_v31, %v269_v4 }
 0x2ad   :  { %v305_v35 = vor.u32 1.1754944e-38, %v304_v30  ;;  %vm303_vm14 = vcmp.eq.f32.partialorder %v302_v33, 8.507059e+37 }
 0x2b1   :  { %v392_v25 = vpop.eup %391 }
 0x2b2   :  { %v294_v28 = vmul.f32 %v392_v25, %v292_v22  ;;  %vm299_vm11 = vweird.f32 %v392_v25 }
 0x2b3   :  { %vm300_vm13 = vmor %vm298_vm12, %vm299_vm11 }
 0x2b4   :  { %v295_v29 = vsub.f32 1.0, %v294_v28 }
 0x2b6   :  { %v296_v32 = vmul.f32 %v392_v25, %v295_v29 }
 0x2b8   :  { %v297_v34 = vadd.f32 %v392_v25, %v296_v32 }
 0x2ba   :  { %v301_v37 = vsel %vm300_vm13, %v392_v25, %v297_v34 }
 0x2bb   :  { %v306_v38 = vsel %vm303_vm14, %v305_v35, %v301_v37 }
 0x2bc   :  { %v307_v39 = vmul.f32 %v306_v38, %v282_v36 }
 0x2be   :  { %v375_v40 = vclamps-f32 %v307_v39, 1.0 }
 0x2c0   :  { %v310_v42 = vadd.f32 1.0, %v375_v40 }
 0x2c2   :  { %v311_v43 = vmul.f32 %v310_v42, %v268_v41 }
 0x2c4   :  { %v312_v44 = vadd.f32 %v311_v43, %v608_v26 }
 0x2c6   :  { %349 = vmatmul.f32.vlgmr.msra.gmra.mxu2 %v312_v44 }
 0x349   :  { %v350_v46 = vpop.f32.mrf.mxu2 }
 0x34a   :  { %v351_v47 = vadd.f32 %v384_v45, %v350_v46 }
 0x34c   :  { %353 = vst [vmem:[#allocation11] sm:$0xff] %v351_v47 }
 0x34d   :  { %364 = dma.vmem_to_hbm [thread:$0]  %s360_s22, 128, %s362_s25, [#allocation4]  }
 0x34e   :  { %543 = dma.done.wait [#allocation4], 128  }
 0x34f   :  { %544 = vsyncadd [#allocation4], 4294967168 }
 0x350   :  { %369 = vsyncpa [#allocation3], 1 }
 0x351   :  { %370 = vsyncpa [#allocation6], 1 }
 0x352   :  { %371 = vsyncpa [#allocation9], 1 }
 0x353   :  { %372 = vsyncpa [#allocation4], 1 }

// kernel: tpu_custom_call.1
= control target key start
LH: loop header
LB: loop body
LE: loop exit
PB: predicated region body
PF: predicated region fallthrough
CT: control target
= control target key end

     0   :  { %11 = vsyncpa [#allocation3], 0  ;;  %s621_s0 = inlined_call_operand.hbm [shape: f32[8,64], index: 0, kind: input, shape index: {}]   ;;  %s622_s1 = inlined_call_operand.hbm [shape: f32[64,128], index: 1, kind: input, shape index: {}]   ;;  %s623_s2 = inlined_call_operand.hbm [shape: f32[128,128], index: 2, kind: input, shape index: {}]   ;;  %s624_s3 = inlined_call_operand.hbm [shape: f32[128,128], index: 3, kind: input, shape index: {}]   ;;  %s625_s4 = inlined_call_operand.hbm [shape: f32[8,128], index: 4, kind: input, shape index: {}]   ;;  %s626_s5 = inlined_call_operand.vmem [shape: f32[1,128], index: 5, kind: input, shape index: {}]   ;;  %s627_s6 = inlined_call_operand.hbm [shape: f32[8,128], index: 6, kind: output, shape index: {}]  }
   0x1   :  { %12 = vsyncpa [#allocation6], 0 }
   0x2   :  { %13 = vsyncpa [#allocation9], 0  ;;  %s30_s23 = sshll.u32 %s622_s1, 4  ;;  %s31_s23 = int_to_ptr.hbm [resolvable:$true] %s30_s23 }
   0x3   :  { %14 = vsyncpa [#allocation4], 0  ;;  %s545_s24 = smov [#allocation5]   ;;  %s56_s28 = sshll.u32 %s624_s3, 4  ;;  %s57_s28 = int_to_ptr.hbm [resolvable:$true] %s56_s28 }
   0x4   :  { %s32_s25 = sshll.u32 %s545_s24, 4  ;;  %s546_s29 = smov 128   ;;  %s33_s25 = int_to_ptr.vmem [resolvable:$true] %s32_s25 }
   0x5   :  { %s547_s30 = smov 8   ;;  %s548_s7 = smov [#allocation8]  }
   0x6   :  { %38 = dma.hbm_to_vmem [thread:$0]  %s31_s23, 1024, %s33_s25, [#allocation6], %s546_s29, %s546_s29, %s547_s30  }
   0x7   :  { %s58_s8 = sshll.u32 %s548_s7, 4  ;;  %s20_s11 = sshll.u32 %s621_s0, 4  ;;  %s59_s8 = int_to_ptr.vmem [resolvable:$true] %s58_s8  ;;  %s21_s11 = int_to_ptr.hbm [resolvable:$true] %s20_s11 }
   0x8   :  { %64 = dma.hbm_to_vmem [thread:$0]  %s57_s28, 2048, %s59_s8, [#allocation9], %s546_s29, %s546_s29, %s547_s30  }
   0x9   :  { %s43_s13 = sshll.u32 %s623_s2, 4  ;;  %s549_s14 = smov [#allocation2]   ;;  %s44_s13 = int_to_ptr.hbm [resolvable:$true] %s43_s13 }
   0xa   :  { %s22_s15 = sshll.u32 %s549_s14, 4  ;;  %s550_s3 = smov [#allocation7]   ;;  %s23_s15 = int_to_ptr.vmem [resolvable:$true] %s22_s15 }
   0xb   :  { %25 = dma.hbm_to_vmem [thread:$0]  %s21_s11, 128, %s23_s15, [#allocation3]  }
   0xc   :  { %s45_s16 = sshll.u32 %s550_s3, 4  ;;  %s70_s19 = sshll.u32 %s625_s4, 4  ;;  %s46_s16 = int_to_ptr.vmem [resolvable:$true] %s45_s16  ;;  %s71_s19 = int_to_ptr.hbm [resolvable:$true] %s70_s19 }
   0xd   :  { %51 = dma.hbm_to_vmem [thread:$0]  %s44_s13, 2048, %s46_s16, [#allocation6], %s546_s29, %s546_s29, %s547_s30  }
   0xe   :  { %s551_s0 = smov [#allocation10]  }
   0xf   :  { %s72_s20 = sshll.u32 %s551_s0, 4  ;;  %s73_s20 = int_to_ptr.vmem [resolvable:$true] %s72_s20 }
  0x10   :  { %75 = dma.hbm_to_vmem [thread:$0]  %s71_s19, 128, %s73_s20, [#allocation9]  }
  0x11   :  { %537 = dma.done.wait [#allocation3], 128  }
  0x12   :  { %538 = vsyncadd [#allocation3], 4294967168 }
  0x13   :  { %539 = dma.done.wait [#allocation6], 3072  }
  0x14   :  { %540 = vsyncadd [#allocation6], 4294964224 }
  0x15   :  { %541 = dma.done.wait [#allocation9], 2176  }
  0x16   :  { %542 = vsyncadd [#allocation9], 4294965120  ;;  %v107_v0 = vld [vmem:[#allocation5 + $0x38] sm:$0xff]  ;;  %v106_v1 = vld [vmem:[#allocation5 + $0x30] sm:$0xff]  ;;  %vm109_vm0 = vcmask 523264   ;;  %s552_s21 = smov [#allocation11]  }
  0x17   :  { %121 = vmatpush.msra.mxu0 %v107_v0  ;;  %v105_v2 = vld [vmem:[#allocation5 + $0x28] sm:$0xff]  ;;  %v104_v3 = vld [vmem:[#allocation5 + $0x20] sm:$0xff]  ;;  %v103_v4 = vld [vmem:[#allocation5 + $0x18] sm:$0xff]  ;;  %s359_s22 = sshll.u32 %s552_s21, 4  ;;  %s361_s25 = sshll.u32 %s627_s6, 4  ;;  %s360_s22 = int_to_ptr.vmem [resolvable:$true] %s359_s22  ;;  %s362_s25 = int_to_ptr.hbm [resolvable:$true] %s361_s25 }
  0x18   :  { %v102_v5 = vld [vmem:[#allocation5 + $0x10] sm:$0xff]  ;;  %v101_v6 = vld [vmem:[#allocation5 + $0x8] sm:$0xff]  ;;  %v100_v7 = vld [vmem:[#allocation5] sm:$0xff] }
  0x19   :  { %122 = vmatpush.msra.mxu0 %v106_v1  ;;  %v99_v8 = vld [vmem:[#allocation2] sm:$0xff]  ;;  %v603_v9 = vld [vmem:[#allocation10] sm:$0xff]  ;;  %v218_v16 = vld [vmem:[#allocation7 + $0x70] sm:$0xff] }
  0x1a   :  { %v108_v10 = vperm.slane %v603_v9, 0  ;;  %v219_v15 = vld [vmem:[#allocation7 + $0x78] sm:$0xff]  ;;  %v217_v17 = vld [vmem:[#allocation7 + $0x68] sm:$0xff]  ;;  %v216_v18 = vld [vmem:[#allocation7 + $0x60] sm:$0xff]  ;;  %v156_v45 = vperm.slane %v603_v9, 1  ;;  %v158_v48 = vperm.slane %v603_v9, 2 }
  0x1b   :  { %123 = vmatpush.msra.mxu0 %v105_v2  ;;  %221 = vmatpush.msra.mxu1 %v219_v15  ;;  %v215_v20 = vld [vmem:[#allocation7 + $0x58] sm:$0xff]  ;;  %v214_v22 = vld [vmem:[#allocation7 + $0x50] sm:$0xff]  ;;  %v213_v25 = vld [vmem:[#allocation7 + $0x48] sm:$0xff] }
  0x1c   :  { %v212_v27 = vld [vmem:[#allocation7 + $0x40] sm:$0xff]  ;;  %v211_v29 = vld [vmem:[#allocation7 + $0x38] sm:$0xff]  ;;  %v210_v31 = vld [vmem:[#allocation7 + $0x30] sm:$0xff] }
  0x1d   :  { %124 = vmatpush.msra.mxu0 %v104_v3  ;;  %222 = vmatpush.msra.mxu1 %v218_v16  ;;  %v209_v32 = vld [vmem:[#allocation7 + $0x28] sm:$0xff]  ;;  %v208_v33 = vld [vmem:[#allocation7 + $0x20] sm:$0xff]  ;;  %v207_v34 = vld [vmem:[#allocation7 + $0x18] sm:$0xff] }
  0x1e   :  { %v206_v37 = vld [vmem:[#allocation7 + $0x10] sm:$0xff]  ;;  %v205_v39 = vld [vmem:[#allocation7 + $0x8] sm:$0xff]  ;;  %v204_v41 = vld [vmem:[#allocation7] sm:$0xff] }
  0x1f   :  { %125 = vmatpush.msra.mxu0 %v103_v4  ;;  %223 = vmatpush.msra.mxu1 %v217_v17 }
  0x21   :  { %126 = vmatpush.msra.mxu0 %v102_v5  ;;  %224 = vmatpush.msra.mxu1 %v216_v18 }
  0x23   :  { %127 = vmatpush.msra.mxu0 %v101_v6  ;;  %225 = vmatpush.msra.mxu1 %v215_v20 }
  0x25   :  { %128 = vmatpush.msra.mxu0 %v100_v7  ;;  %226 = vmatpush.msra.mxu1 %v214_v22 }
  0x26   :  { %373 = vmatmul.msk.f32.vlgmr.msra.gmra.mxu0 %vm109_vm0, %v99_v8 }
  0x27   :  { %227 = vmatpush.msra.mxu1 %v213_v25 }
  0x29   :  { %228 = vmatpush.msra.mxu1 %v212_v27  ;;  %v220_v27 = vperm.slane %v603_v9, 3 }
  0x2b   :  { %229 = vmatpush.msra.mxu1 %v211_v29 }
  0x2d   :  { %230 = vmatpush.msra.mxu1 %v210_v31 }
  0x2f   :  { %231 = vmatpush.msra.mxu1 %v209_v32  ;;  %v328_v32 = vld [vmem:[#allocation8 + $0x78] sm:$0xff] }
  0x30   :  { %333 = vmatpush.msra.mxu2 %v328_v32 }
  0x31   :  { %232 = vmatpush.msra.mxu1 %v208_v33  ;;  %v327_v33 = vld [vmem:[#allocation8 + $0x70] sm:$0xff] }
  0x32   :  { %334 = vmatpush.msra.mxu2 %v327_v33 }
  0x33   :  { %233 = vmatpush.msra.mxu1 %v207_v34  ;;  %v326_v34 = vld [vmem:[#allocation8 + $0x68] sm:$0xff] }
  0x34   :  { %335 = vmatpush.msra.mxu2 %v326_v34 }
  0x35   :  { %234 = vmatpush.msra.mxu1 %v206_v37 }
  0x37   :  { %235 = vmatpush.msra.mxu1 %v205_v39 }
  0x39   :  { %236 = vmatpush.msra.mxu1 %v204_v41  ;;  %v323_v41 = vld [vmem:[#allocation8 + $0x50] sm:$0xff] }
  0xa3   :  { %v130_v11 = vpop.f32.mrf.mxu0 }
  0xa4   :  { %v131_v12 = vadd.f32 %v130_v11, %v108_v10 }
  0xa6   :  { %133 = vadd.xlane.f32.xlu0 %v131_v12  ;;  %v135_v13 = vmul.f32 %v131_v12, %v131_v12 }
  0xae   :  { %136 = vadd.xlane.f32.xlu0 %v135_v13 }
 0x119   :  { %v134_v14 = vpop.xlane.xlu0 %133 }
 0x11a   :  { %v138_v19 = vmul.f32 0.015625, %v134_v14 }
 0x11c   :  { %v140_v23 = vmul.f32 %v138_v19, %v138_v19  ;;  %v143_v44 = vsub.f32 %v131_v12, %v138_v19 }
 0x121   :  { %v137_v21 = vpop.xlane.xlu0 %136 }
 0x122   :  { %v139_v24 = vmul.f32 0.015625, %v137_v21 }
 0x124   :  { %v141_v26 = vsub.f32 %v139_v24, %v140_v23 }
 0x126   :  { %v142_v28 = vmax.f32 %v141_v26, 0.0 }
 0x128   :  { %v144_v30 = vadd.f32 1e-05, %v142_v28 }
 0x12a   :  { %385 = vrsqrt.f32 %v144_v30  ;;  %vm151_vm2 = vweird.f32 %v144_v30 }
 0x130   :  { %v386_v35 = vpop.eup %385 }
 0x131   :  { %v146_v36 = vmul.f32 %v386_v35, %v144_v30  ;;  %vm152_vm1 = vweird.f32 %v386_v35 }
 0x132   :  { %vm153_vm3 = vmor %vm151_vm2, %vm152_vm1 }
 0x133   :  { %v147_v38 = vmul.f32 %v386_v35, %v146_v36  ;;  %v325_v36 = vld [vmem:[#allocation8 + $0x60] sm:$0xff] }
 0x134   :  { %336 = vmatpush.msra.mxu2 %v325_v36 }
 0x135   :  { %v148_v40 = vmul.f32 0.5, %v147_v38  ;;  %v324_v38 = vld [vmem:[#allocation8 + $0x58] sm:$0xff] }
 0x136   :  { %337 = vmatpush.msra.mxu2 %v324_v38 }
 0x137   :  { %v149_v42 = vsub.f32 1.5, %v148_v40 }
 0x138   :  { %338 = vmatpush.msra.mxu2 %v323_v41 }
 0x139   :  { %v150_v43 = vmul.f32 %v386_v35, %v149_v42 }
 0x13b   :  { %v154_v46 = vsel %vm153_vm3, %v386_v35, %v150_v43  ;;  %v322_v43 = vld [vmem:[#allocation8 + $0x48] sm:$0xff] }
 0x13c   :  { %v155_v47 = vmul.f32 %v154_v46, %v143_v44  ;;  %339 = vmatpush.msra.mxu2 %v322_v43 }
 0x13e   :  { %v157_v49 = vmul.f32 %v156_v45, %v155_v47  ;;  %v321_v45 = vld [vmem:[#allocation8 + $0x40] sm:$0xff]  ;;  %v320_v47 = vld [vmem:[#allocation8 + $0x38] sm:$0xff] }
 0x13f   :  { %340 = vmatpush.msra.mxu2 %v321_v45  ;;  %v384_v45 = vld [vmem:[%s626_s5] ss:$0 sm:$0xff] }
 0x140   :  { %v159_v50 = vadd.f32 %v158_v48, %v157_v49  ;;  %v319_v48 = vld [vmem:[#allocation8 + $0x30] sm:$0xff]  ;;  %v318_v49 = vld [vmem:[#allocation8 + $0x28] sm:$0xff] }
 0x141   :  { %341 = vmatpush.msra.mxu2 %v320_v47 }
 0x142   :  { %v161_v51 = vmul.f32 0.70710677, %v159_v50  ;;  %v160_v24 = vmul.f32 0.5, %v159_v50  ;;  %v317_v50 = vld [vmem:[#allocation8 + $0x20] sm:$0xff] }
 0x143   :  { %342 = vmatpush.msra.mxu2 %v319_v48 }
 0x144   :  { %v162_v52 = vmul.f32 %v161_v51, %v161_v51 }
 0x145   :  { %343 = vmatpush.msra.mxu2 %v318_v49 }
 0x146   :  { %v163_v53 = vmin.f32 %v162_v52, 16.0 }
 0x147   :  { %344 = vmatpush.msra.mxu2 %v317_v50 }
 0x148   :  { %v164_v54 = vmul.f32 2.1237322e-06, %v163_v53  ;;  %v175_v55 = vmul.f32 3.8918573e-05, %v163_v53 }
 0x14a   :  { %v165_v56 = vadd.f32 0.00028619796, %v164_v54  ;;  %v176_v57 = vadd.f32 0.001143296, %v175_v55  ;;  %v315_v55 = vld [vmem:[#allocation8 + $0x10] sm:$0xff] }
 0x14c   :  { %v166_v58 = vmul.f32 %v165_v56, %v163_v53  ;;  %v177_v59 = vmul.f32 %v176_v57, %v163_v53  ;;  %v314_v57 = vld [vmem:[#allocation8 + $0x8] sm:$0xff] }
 0x14e   :  { %v178_v60 = vadd.f32 0.014752088, %v177_v59  ;;  %v167_v61 = vadd.f32 0.0036580483, %v166_v58  ;;  %v313_v59 = vld [vmem:[#allocation8] sm:$0xff] }
 0x150   :  { %v179_v62 = vmul.f32 %v178_v60, %v163_v53  ;;  %v168_v0 = vmul.f32 %v167_v61, %v163_v53 }
 0x152   :  { %v180_v63 = vadd.f32 0.112945676, %v179_v62  ;;  %v169_v3 = vadd.f32 0.05243302, %v168_v0  ;;  %v264_v62 = vperm.slane %v603_v9, 4 }
 0x154   :  { %v181_v1 = vmul.f32 %v180_v63, %v163_v53  ;;  %v170_v6 = vmul.f32 %v169_v3, %v163_v53 }
 0x156   :  { %v182_v2 = vadd.f32 0.4994258, %v181_v1  ;;  %v171_v7 = vadd.f32 0.18741608, %v170_v6  ;;  %v266_v1 = vperm.slane %v603_v9, 5 }
 0x158   :  { %v183_v4 = vmul.f32 %v182_v2, %v163_v53  ;;  %v172_v10 = vmul.f32 %v171_v7, %v163_v53  ;;  %v316_v53 = vld [vmem:[#allocation8 + $0x18] sm:$0xff] }
 0x159   :  { %345 = vmatpush.msra.mxu2 %v316_v53 }
 0x15a   :  { %v184_v5 = vadd.f32 1.0, %v183_v4  ;;  %v173_v14 = vadd.f32 1.1283791, %v172_v10 }
 0x15b   :  { %346 = vmatpush.msra.mxu2 %v315_v55 }
 0x15c   :  { %387 = vrcp.f32 %v184_v5  ;;  %v196_v13 = vand.u32 2147483648, %v184_v5  ;;  %v194_v16 = vand.u32 2147483647, %v184_v5  ;;  %vm190_vm5 = vweird.f32 %v184_v5 }
 0x15d   :  { %v174_v19 = vmul.f32 %v173_v14, %v161_v51  ;;  %347 = vmatpush.msra.mxu2 %v314_v57 }
 0x15e   :  { %v197_v18 = vor.u32 1.1754944e-38, %v196_v13  ;;  %vm195_vm7 = vcmp.eq.f32.partialorder %v194_v16, 8.507059e+37 }
 0x15f   :  { %348 = vmatpush.msra.mxu2 %v313_v59 }
 0x162   :  { %v388_v8 = vpop.eup %387 }
 0x163   :  { %v186_v11 = vmul.f32 %v388_v8, %v184_v5  ;;  %vm191_vm4 = vweird.f32 %v388_v8 }
 0x164   :  { %vm192_vm6 = vmor %vm190_vm5, %vm191_vm4 }
 0x165   :  { %v187_v12 = vsub.f32 1.0, %v186_v11 }
 0x167   :  { %v188_v15 = vmul.f32 %v388_v8, %v187_v12 }
 0x169   :  { %v189_v17 = vadd.f32 %v388_v8, %v188_v15 }
 0x16b   :  { %v193_v20 = vsel %vm192_vm6, %v388_v8, %v189_v17 }
 0x16c   :  { %v198_v21 = vsel %vm195_vm7, %v197_v18, %v193_v20 }
 0x16d   :  { %v199_v22 = vmul.f32 %v198_v21, %v174_v19 }
 0x16f   :  { %v374_v23 = vclamps-f32 %v199_v22, 1.0 }
 0x171   :  { %v202_v25 = vadd.f32 1.0, %v374_v23 }
 0x173   :  { %v608_v26 = vmul.f32 %v202_v25, %v160_v24 }
 0x175   :  { %237 = vmatmul.f32.vlgmr.msra.gmra.mxu1 %v608_v26 }
 0x1f2   :  { %v238_v28 = vpop.f32.mrf.mxu1 }
 0x1f3   :  { %v239_v29 = vadd.f32 %v238_v28, %v220_v27 }
 0x1f5   :  { %241 = vadd.xlane.f32.xlu1 %v239_v29  ;;  %v243_v30 = vmul.f32 %v239_v29, %v239_v29 }
 0x1fd   :  { %244 = vadd.xlane.f32.xlu1 %v243_v30 }
 0x268   :  { %v242_v31 = vpop.xlane.xlu1 %241 }
 0x269   :  { %v246_v35 = vmul.f32 0.015625, %v242_v31 }
 0x26b   :  { %v248_v39 = vmul.f32 %v246_v35, %v246_v35  ;;  %v251_v61 = vsub.f32 %v239_v29, %v246_v35 }
 0x270   :  { %v245_v37 = vpop.xlane.xlu1 %244 }
 0x271   :  { %v247_v40 = vmul.f32 0.015625, %v245_v37 }
 0x273   :  { %v249_v42 = vsub.f32 %v247_v40, %v248_v39 }
 0x275   :  { %v250_v44 = vmax.f32 %v249_v42, 0.0 }
 0x277   :  { %v252_v46 = vadd.f32 1e-05, %v250_v44 }
 0x279   :  { %389 = vrsqrt.f32 %v252_v46  ;;  %vm259_vm9 = vweird.f32 %v252_v46 }
 0x27f   :  { %v390_v51 = vpop.eup %389 }
 0x280   :  { %v254_v52 = vmul.f32 %v390_v51, %v252_v46  ;;  %vm260_vm8 = vweird.f32 %v390_v51 }
 0x281   :  { %vm261_vm10 = vmor %vm259_vm9, %vm260_vm8 }
 0x282   :  { %v255_v54 = vmul.f32 %v390_v51, %v254_v52 }
 0x284   :  { %v256_v56 = vmul.f32 0.5, %v255_v54 }
 0x286   :  { %v257_v58 = vsub.f32 1.5, %v256_v56 }
 0x288   :  { %v258_v60 = vmul.f32 %v390_v51, %v257_v58 }
 0x28a   :  { %v262_v63 = vsel %vm261_vm10, %v390_v51, %v258_v60 }
 0x28b   :  { %v263_v0 = vmul.f32 %v262_v63, %v251_v61 }
 0x28d   :  { %v265_v2 = vmul.f32 %v264_v62, %v263_v0 }
 0x28f   :  { %v267_v3 = vadd.f32 %v266_v1, %v265_v2 }
 0x291   :  { %v269_v4 = vmul.f32 0.70710677, %v267_v3  ;;  %v268_v41 = vmul.f32 0.5, %v267_v3 }
 0x293   :  { %v270_v5 = vmul.f32 %v269_v4, %v269_v4 }
 0x295   :  { %v271_v6 = vmin.f32 %v270_v5, 16.0 }
 0x297   :  { %v272_v7 = vmul.f32 2.1237322e-06, %v271_v6  ;;  %v283_v8 = vmul.f32 3.8918573e-05, %v271_v6 }
 0x299   :  { %v273_v10 = vadd.f32 0.00028619796, %v272_v7  ;;  %v284_v11 = vadd.f32 0.001143296, %v283_v8 }
 0x29b   :  { %v274_v12 = vmul.f32 %v273_v10, %v271_v6  ;;  %v285_v13 = vmul.f32 %v284_v11, %v271_v6 }
 0x29d   :  { %v286_v14 = vadd.f32 0.014752088, %v285_v13  ;;  %v275_v15 = vadd.f32 0.0036580483, %v274_v12 }
 0x29f   :  { %v287_v16 = vmul.f32 %v286_v14, %v271_v6  ;;  %v276_v18 = vmul.f32 %v275_v15, %v271_v6 }
 0x2a1   :  { %v288_v17 = vadd.f32 0.112945676, %v287_v16  ;;  %v277_v21 = vadd.f32 0.05243302, %v276_v18 }
 0x2a3   :  { %v289_v19 = vmul.f32 %v288_v17, %v271_v6  ;;  %v278_v23 = vmul.f32 %v277_v21, %v271_v6 }
 0x2a5   :  { %v290_v20 = vadd.f32 0.4994258, %v289_v19  ;;  %v279_v24 = vadd.f32 0.18741608, %v278_v23 }
 0x2a7   :  { %v291_v9 = vmul.f32 %v290_v20, %v271_v6  ;;  %v280_v27 = vmul.f32 %v279_v24, %v271_v6 }
 0x2a9   :  { %v292_v22 = vadd.f32 1.0, %v291_v9  ;;  %v281_v31 = vadd.f32 1.1283791, %v280_v27 }
 0x2ab   :  { %391 = vrcp.f32 %v292_v22  ;;  %v304_v30 = vand.u32 2147483648, %v292_v22  ;;  %v302_v33 = vand.u32 2147483647, %v292_v22  ;;  %vm298_vm12 = vweird.f32 %v292_v22 }
 0x2ac   :  { %v282_v36 = vmul.f32 %v281_v31, %v269_v4 }
 0x2ad   :  { %v305_v35 = vor.u32 1.1754944e-38, %v304_v30  ;;  %vm303_vm14 = vcmp.eq.f32.partialorder %v302_v33, 8.507059e+37 }
 0x2b1   :  { %v392_v25 = vpop.eup %391 }
 0x2b2   :  { %v294_v28 = vmul.f32 %v392_v25, %v292_v22  ;;  %vm299_vm11 = vweird.f32 %v392_v25 }
 0x2b3   :  { %vm300_vm13 = vmor %vm298_vm12, %vm299_vm11 }
 0x2b4   :  { %v295_v29 = vsub.f32 1.0, %v294_v28 }
 0x2b6   :  { %v296_v32 = vmul.f32 %v392_v25, %v295_v29 }
 0x2b8   :  { %v297_v34 = vadd.f32 %v392_v25, %v296_v32 }
 0x2ba   :  { %v301_v37 = vsel %vm300_vm13, %v392_v25, %v297_v34 }
 0x2bb   :  { %v306_v38 = vsel %vm303_vm14, %v305_v35, %v301_v37 }
 0x2bc   :  { %v307_v39 = vmul.f32 %v306_v38, %v282_v36 }
 0x2be   :  { %v375_v40 = vclamps-f32 %v307_v39, 1.0 }
 0x2c0   :  { %v310_v42 = vadd.f32 1.0, %v375_v40 }
 0x2c2   :  { %v311_v43 = vmul.f32 %v310_v42, %v268_v41 }
 0x2c4   :  { %v312_v44 = vadd.f32 %v311_v43, %v608_v26 }
 0x2c6   :  { %349 = vmatmul.f32.vlgmr.msra.gmra.mxu2 %v312_v44 }
 0x349   :  { %v350_v46 = vpop.f32.mrf.mxu2 }
 0x34a   :  { %v351_v47 = vadd.f32 %v384_v45, %v350_v46 }
 0x34c   :  { %353 = vst [vmem:[#allocation11] sm:$0xff] %v351_v47 }
 0x34d   :  { %364 = dma.vmem_to_hbm [thread:$0]  %s360_s22, 128, %s362_s25, [#allocation4]  }
 0x34e   :  { %543 = dma.done.wait [#allocation4], 128  }
 0x34f   :  { %544 = vsyncadd [#allocation4], 4294967168 }
 0x350   :  { %369 = vsyncpa [#allocation3], 1 }
 0x351   :  { %370 = vsyncpa [#allocation6], 1 }
 0x352   :  { %371 = vsyncpa [#allocation9], 1 }
 0x353   :  { %372 = vsyncpa [#allocation4], 1 }

</bundles_post_ra>
